<compile_context>
chip_gen: v6e
topology: v6e:2x2x1
jax: 0.10.0
libtpu: 0.0.40
codegen_flags: <defaults>
</compile_context>

<pallas_src>
import jax
import jax.numpy as jnp
from jax import lax
from jax.experimental import pallas as pl
from jax.experimental.pallas import tpu as pltpu


def build_pe_table(max_seq_len: int, d_model: int) -> jnp.ndarray:
    """Deterministic parameter init, mirroring PositionalEncoding.__init__."""
    assert d_model % 2 == 0
    i_seq = jnp.linspace(0.0, max_seq_len - 1, max_seq_len)
    j_seq = jnp.linspace(0.0, d_model - 2, d_model // 2)
    # torch.meshgrid defaults to 'ij' indexing
    pos, two_i = jnp.meshgrid(i_seq, j_seq, indexing="ij")
    pe_2i = jnp.sin(pos / 10000.0 ** (two_i / d_model))
    pe_2i_1 = jnp.cos(pos / 10000.0 ** (two_i / d_model))
    pe = jnp.stack((pe_2i, pe_2i_1), axis=2).reshape(max_seq_len, d_model)
    return pe.astype(jnp.float32)


def _round_up(x: int, m: int) -> int:
    return ((x + m - 1) // m) * m


def _lookup_kernel(t_ref, pe_ref, out_ref):
    """One-hot MXU gather of block_b rows from the VMEM-resident pe table.

    t_ref  : VMEM ref, int32 [block_b, 1]            (this block's indices)
    pe_ref : VMEM ref, f32   [max_seq_len, d_model]  (resident, constant index_map)
    out_ref: VMEM ref, f32   [block_b, d_model]
    """
    max_seq_len = pe_ref.shape[0]
    block_b = out_ref.shape[0]

    idx = t_ref[...]                                             # (block_b, 1) int32
    row_ids = lax.broadcasted_iota(jnp.int32, (block_b, max_seq_len), 1)
    one_hot = (idx == row_ids).astype(jnp.float32)               # (block_b, max_seq_len)
    # Exactly one 1.0 per row -> result is bit-exact pe[idx]; single dense store.
    out_ref[...] = jnp.dot(
        one_hot, pe_ref[...], preferred_element_type=jnp.float32
    ).astype(out_ref.dtype)


def positional_encoding_lookup(t: jnp.ndarray, pe: jnp.ndarray,
                               block_b: int | None = None) -> jnp.ndarray:
    """forward(t) = pe[t].  t: int [B]  ->  [B, d_model] float32."""
    (batch,) = t.shape
    max_seq_len, d_model = pe.shape

    if block_b is None:
        # Large, sublane-dense tile: multiple of 8, capped at 512 rows per step.
        block_b = min(512, _round_up(batch, 8))
    assert block_b % 8 == 0

    padded_batch = _round_up(batch, block_b)

    # Clamp indices (embedding semantics assume valid ids; avoids OOB reads) and
    # pad batch up to a multiple of the block size (padded rows read pe[0] and
    # are sliced off below).
    t32 = jnp.clip(t.astype(jnp.int32), 0, max_seq_len - 1)
    if padded_batch != batch:
        t32 = jnp.pad(t32, (0, padded_batch - batch))
    t2d = t32.reshape(padded_batch, 1)

    grid = (padded_batch // block_b,)

    # Only override the scoped VMEM limit when the resident table + tiles would
    # actually need it (large tables, e.g. on v7x's 64 MiB VMEM).
    table_bytes = max_seq_len * d_model * pe.dtype.itemsize
    tile_bytes = 2 * block_b * d_model * 4 + 2 * block_b * 4  # dbl-buffered out + t
    vmem_needed = table_bytes + tile_bytes
    cp_kwargs = dict(dimension_semantics=("parallel",))
    if vmem_needed > 24 * 1024 * 1024:
        cp_kwargs["vmem_limit_bytes"] = min(int(vmem_needed * 3 // 2),
                                            100 * 1024 * 1024)

    out = pl.pallas_call(
        _lookup_kernel,
        out_shape=jax.ShapeDtypeStruct((padded_batch, d_model), pe.dtype),
        grid=grid,
        in_specs=[
            # Per-block index column (VMEM).
            pl.BlockSpec((block_b, 1), lambda i: (i, 0)),
            # Full table, constant index_map -> DMA'd once, stays VMEM-resident.
            pl.BlockSpec((max_seq_len, d_model), lambda i: (0, 0)),
        ],
        out_specs=pl.BlockSpec((block_b, d_model), lambda i: (i, 0)),
        compiler_params=pltpu.CompilerParams(**cp_kwargs),
    )(t2d, pe)

    return out[:batch]


if __name__ == "__main__":
    max_seq_len = 64
    d_model = 128
    batch = 8

    pe = build_pe_table(max_seq_len, d_model)

    key = jax.random.PRNGKey(0)
    t = jax.random.randint(key, (batch,), minval=0, maxval=max_seq_len,
                           dtype=jnp.int32)

    out = positional_encoding_lookup(t, pe)
    out = jax.block_until_ready(out)

    # Reference: plain JAX embedding lookup.
    ref = pe[t]
    assert out.shape == (batch, d_model)
    assert out.dtype == jnp.float32
    assert jnp.allclose(out, ref, atol=1e-6, rtol=1e-6)

    print("KERNEL_OK")
</pallas_src>

<mosaic_0001>
module attributes {stable_mosaic.version = 11 : i64} {
  func.func @_lookup_kernel(%arg0: i32, %arg1: memref<8x1xi32, #tpu.memory_space<vmem>>, %arg2: memref<64x128xf32, #tpu.memory_space<vmem>>, %arg3: memref<8x128xf32, #tpu.memory_space<vmem>>) attributes {dimension_semantics = [#tpu.dimension_semantics<parallel>], iteration_bounds = array<i64: 1>, scalar_prefetch = 0 : i64, scratch_operands = 0 : i64, tpu.core_type = #tpu.core_type<tc>, window_params = [{transform_indices = @transform_0, window_bounds = array<i64: 8, 1>}, {pipeline_mode = #tpu.pipeline_mode<synchronous>, transform_indices = @transform_1, window_bounds = array<i64: 64, 128>}, {transform_indices = @transform_2, window_bounds = array<i64: 8, 128>}]} {
    %c0 = arith.constant 0 : index
    %c0_0 = arith.constant 0 : index
    %0 = vector.load %arg1[%c0, %c0_0] : memref<8x1xi32, #tpu.memory_space<vmem>>, vector<8x1xi32>
    %1 = tpu.iota {dimensions = array<i32: 1>} : vector<8x64xi32>
    %2 = vector.broadcast %0 : vector<8x1xi32> to vector<8x64xi32>
    %3 = arith.cmpi eq, %2, %1 : vector<8x64xi32>
    %4 = arith.extui %3 : vector<8x64xi1> to vector<8x64xi32>
    %5 = arith.sitofp %4 : vector<8x64xi32> to vector<8x64xf32>
    %c0_1 = arith.constant 0 : index
    %c0_2 = arith.constant 0 : index
    %6 = vector.load %arg2[%c0_1, %c0_2] : memref<64x128xf32, #tpu.memory_space<vmem>>, vector<64x128xf32>
    %cst = arith.constant dense<0.000000e+00> : vector<8x128xf32>
    %7 = tpu.matmul %5, %6, %cst {dimension_numbers = #tpu.dot_dimension_numbers<[1], [0], [0], [1], [0, 0, 1, 1], [], []>} : vector<8x64xf32>, vector<64x128xf32>, vector<8x128xf32> -> vector<8x128xf32>
    %c0_3 = arith.constant 0 : index
    %c0_4 = arith.constant 0 : index
    %8 = vector.load %arg3[%c0_3, %c0_4] : memref<8x128xf32, #tpu.memory_space<vmem>>, vector<8x128xf32>
    tpu.vector_store %arg3[%c0_3, %c0_4], %7 {strides = array<i32>} : memref<8x128xf32, #tpu.memory_space<vmem>>, vector<8x128xf32>,
    return
  }
  func.func @transform_0(%arg0: i32) -> (i32, i32) {
    %c0_i32 = arith.constant 0 : i32
    %c0_i32_0 = arith.constant 0 : i32
    return %arg0, %c0_i32 : i32, i32
  }
  func.func @transform_1(%arg0: i32) -> (i32, i32) {
    %c0_i32 = arith.constant 0 : i32
    %c0_i32_0 = arith.constant 0 : i32
    %c0_i32_1 = arith.constant 0 : i32
    return %c0_i32, %c0_i32_0 : i32, i32
  }
  func.func @transform_2(%arg0: i32) -> (i32, i32) {
    %c0_i32 = arith.constant 0 : i32
    %c0_i32_0 = arith.constant 0 : i32
    return %arg0, %c0_i32 : i32, i32
  }
}

</mosaic_0001>

<bundles_post_ra>
// kernel: tpu_custom_call.1
= control target key start
LH: loop header
LB: loop body
LE: loop exit
PB: predicated region body
PF: predicated region fallthrough
CT: control target
= control target key end

     0   :  { %7 = vsyncpa [#allocation3], 0  ;;  %s246_s0 = inlined_call_operand.vmem [shape: s32[8,1], index: 0, kind: input, shape index: {}]   ;;  %s247_s1 = inlined_call_operand.hbm [shape: f32[64,128], index: 1, kind: input, shape index: {}]   ;;  %s248_s2 = inlined_call_operand.hbm [shape: f32[8,128], index: 2, kind: output, shape index: {}]  }
   0x1   :  { %8 = vsyncpa [#allocation4], 0  ;;  %s215_s9 = smov [#allocation2]  }
   0x2   :  { %s16_s10 = sshll.u32 %s215_s9, 4  ;;  %s17_s10 = int_to_ptr.vmem [resolvable:$true] %s16_s10 }
   0x3   :  { %s179_s11 = scalar_lea.vmem %s17_s10, 1024  ;;  %p184_p1 = scmp.lt.s32.totalorder %s17_s10, %s17_s10 }
   0x4   :  { %p180_p0 = scmp.ne.s32.totalorder %s17_s10, %s179_s11  ;;  %p185_p2 = scmp.lt.s32.totalorder %s179_s11, %s179_s11 }
   0x6   :  { %p186_p3 = por %p185_p2, %p184_p1 }
   0x8   :  { %p187_p4 = pnand %p186_p3, %p180_p0 }
   0xa   :  { %190 = shalt.err (!%p187_p4)
}
   0xb   :  { %s216_s12 = smov 128   ;;  %s217_s13 = smov 8  }
   0xc   :  { %22 = dma.hbm_to_vmem [thread:$0]  %s247_s1, 1024, %s17_s10, [#allocation3], %s216_s12, %s216_s12, %s217_s13  }
   0xd   :  { %211 = dma.done.wait [#allocation3], 1024  }
   0xe   :  { %212 = vsyncadd [#allocation3], 4294966272  ;;  %v218_v0 = vmov 0   ;;  %v219_v1 = vmov 0.0   ;;  %vm220_vm0 = vmmov 0   ;;  %v26_v2 = vld [vmem:[%s246_s0] sm:$0xff]  ;;  %v27_v11 = vlaneseq }
   0xf   :  { %170 = vset.pattern.permute.xlu0 %v218_v0  ;;  %144 = vmatprep.subr.mxu0 %v219_v1  ;;  %v42_v3 = vld [vmem:[#allocation2 + $0x38] sm:$0xff]  ;;  %v41_v4 = vld [vmem:[#allocation2 + $0x30] sm:$0xff]  ;;  %v40_v5 = vld [vmem:[#allocation2 + $0x28] sm:$0xff]  ;;  %vm43_vm1 = vcmask 523264   ;;  %s221_s0 = smov [#allocation5]  }
  0x10   :  { %160 = vmatprep.mubr.msk.f32.mxu0 %vm220_vm0, %v219_v1  ;;  %30 = vperm.xlu0 %170, %v26_v2   ;;  %v39_v6 = vld [vmem:[#allocation2 + $0x20] sm:$0xff]  ;;  %v38_v7 = vld [vmem:[#allocation2 + $0x18] sm:$0xff]  ;;  %v37_v8 = vld [vmem:[#allocation2 + $0x10] sm:$0xff]  ;;  %v28_v12 = vand.u32 127, %v27_v11  ;;  %s124_s1 = sshll.u32 %s221_s0, 4  ;;  %s125_s1 = int_to_ptr.vmem [resolvable:$true] %s124_s1 }
  0x11   :  { %145 = vmatpush3.msra.mxu0 %v42_v3  ;;  %v36_v9 = vld [vmem:[#allocation2 + $0x8] sm:$0xff]  ;;  %v35_v10 = vld [vmem:[#allocation2] sm:$0xff]  ;;  %s191_s18 = scalar_lea.vmem %s125_s1, 128  ;;  %p196_p6 = scmp.lt.s32.totalorder %s125_s1, %s125_s1 }
  0x12   :  { %146 = vmatprep.subr.mxu0 %v219_v1  ;;  %p192_p5 = scmp.ne.s32.totalorder %s125_s1, %s191_s18  ;;  %p197_p7 = scmp.lt.s32.totalorder %s191_s18, %s191_s18 }
  0x13   :  { %147 = vmatpush3.msra.mxu0 %v41_v4 }
  0x14   :  { %148 = vmatprep.subr.mxu0 %v219_v1  ;;  %p198_p8 = por %p197_p7, %p196_p6 }
  0x15   :  { %149 = vmatpush3.msra.mxu0 %v40_v5 }
  0x16   :  { %150 = vmatprep.subr.mxu0 %v219_v1  ;;  %p199_p9 = pnand %p198_p8, %p192_p5 }
  0x17   :  { %151 = vmatpush3.msra.mxu0 %v39_v6 }
  0x18   :  { %152 = vmatprep.subr.mxu0 %v219_v1 }
  0x19   :  { %153 = vmatpush3.msra.mxu0 %v38_v7 }
  0x1a   :  { %154 = vmatprep.subr.mxu0 %v219_v1 }
  0x1b   :  { %155 = vmatpush3.msra.mxu0 %v37_v8 }
  0x1c   :  { %156 = vmatprep.subr.mxu0 %v219_v1 }
  0x1d   :  { %157 = vmatpush3.msra.mxu0 %v36_v9 }
  0x1e   :  { %158 = vmatprep.subr.mxu0 %v219_v1 }
  0x1f   :  { %159 = vmatpush3.msra.mxu0 %v35_v10 }
  0x8b   :  { %v31_v13 = vpop.permute.xlu0 %30 }
  0x8c   :  { %vm32_vm2 = vcmp.eq.s32.totalorder %v31_v13, %v28_v12 }
  0x8d   :  { %v133_v14 = vsel %vm32_vm2, 1.0, %v219_v1 }
  0x8e   :  { %161 = vmatmul.mubr.msk.f32.vlgmr.msra.gmra.mxu0 %vm43_vm1, %v133_v14 }
 0x14e   :  { %v113_v15 = vpop.f32.mrf.mxu0 }
 0x14f   :  { %117 = vst [vmem:[#allocation5] sm:$0xff] %v113_v15 }
 0x150   :  { %v162_v16 = vpop.f32.mrf.mxu0 }
 0x151   :  { %202 = shalt.err (!%p199_p9)
}
 0x152   :  { %127 = dma.vmem_to_hbm [thread:$0]  %s125_s1, 128, %s248_s2, [#allocation4]  }
 0x153   :  { %213 = dma.done.wait [#allocation4], 128  }
 0x154   :  { %214 = vsyncadd [#allocation4], 4294967168 }
 0x155   :  { %131 = vsyncpa [#allocation3], 1 }
 0x156   :  { %132 = vsyncpa [#allocation4], 1 }

</bundles_post_ra>
